<compile_context>
chip_gen: v6e
topology: v6e:2x2x1
jax: 0.10.0
libtpu: 0.0.40
codegen_flags: <defaults>
</compile_context>

<pallas_src>
import functools

import jax
import jax.numpy as jnp
from jax.experimental import pallas as pl
from jax.experimental.pallas import tpu as pltpu


def _round_up(a, b):
    return (a + b - 1) // b * b


def _pool_dh_kernel(x_ref, o_ref, *, wi):
    # x_ref: (tr, 2, th, 2*wi)  -- lane index l = h_parity * wi + w  (w in [0, wi))
    # o_ref: (tr, th, wi)       -- D- and H-pooled, W still un-pooled
    d0h0 = x_ref[:, 0, :, :wi]
    d1h0 = x_ref[:, 1, :, :wi]
    d0h1 = x_ref[:, 0, :, wi:]
    d1h1 = x_ref[:, 1, :, wi:]
    # pairwise max tree (depth 2 instead of a serial chain)
    o_ref[...] = jnp.maximum(jnp.maximum(d0h0, d1h0), jnp.maximum(d0h1, d1h1))


def maxpool3d_k2_s2(x, *, vmem_budget_bytes=2 << 20):
    """MaxPool3d(kernel_size=2, stride=2) on NCDHW input via a Pallas TPU kernel."""
    N, C, D, H, W = x.shape
    Do, Ho, Wo = D // 2, H // 2, W // 2
    if Do == 0 or Ho == 0 or Wo == 0:
        raise ValueError("spatial dims must be >= 2 for kernel_size=2, stride=2")
    Wi = 2 * Wo

    # floor-mode crop (a no-op slice when D/H/W are already even)
    x = x[:, :, : 2 * Do, : 2 * Ho, :Wi]

    R = N * C * Do
    # Pure reshape (no transpose, no extra HBM pass): (R, d_parity, Ho, h_parity*Wi)
    x4 = x.reshape(R, 2, Ho, 2 * Wi)

    itemsize = jnp.dtype(x.dtype).itemsize
    sub = max(8, 32 // itemsize)        # sublane tile: 8 for f32, 16 for bf16, ...
    lane = 128

    # Size tiles by (padded) bytes, not element counts.
    in_row_bytes = 2 * _round_up(Ho, sub) * _round_up(2 * Wi, lane) * itemsize
    if in_row_bytes <= vmem_budget_bytes:
        th = Ho
        tr = max(1, min(R, vmem_budget_bytes // in_row_bytes))
        # keep >= 2 grid steps so both v7x TensorCores get work
        if tr >= R and R > 1:
            tr = pl.cdiv(R, 2)
    else:
        # a single (n,c,do) slab is already big: tile the H axis instead
        tr = 1
        th = (vmem_budget_bytes // (2 * _round_up(2 * Wi, lane) * itemsize)) // sub * sub
        th = min(max(sub, th), Ho)

    grid = (pl.cdiv(R, tr), pl.cdiv(Ho, th))

    in_blk_bytes = tr * 2 * _round_up(th, sub) * _round_up(2 * Wi, lane) * itemsize
    out_blk_bytes = tr * _round_up(th, sub) * _round_up(Wi, lane) * itemsize
    vmem_limit = int(max(32 << 20, min(4 * (in_blk_bytes + out_blk_bytes), 100 << 20)))

    kernel = functools.partial(_pool_dh_kernel, wi=Wi)

    y = pl.pallas_call(
        kernel,
        out_shape=jax.ShapeDtypeStruct((R, Ho, Wi), x.dtype),
        grid_spec=pltpu.PrefetchScalarGridSpec(
            num_scalar_prefetch=0,
            grid=grid,
            in_specs=[pl.BlockSpec((tr, 2, th, 2 * Wi), lambda i, j: (i, 0, j, 0))],
            out_specs=pl.BlockSpec((tr, th, Wi), lambda i, j: (i, j, 0)),
        ),
        compiler_params=pltpu.CompilerParams(
            dimension_semantics=("parallel", "parallel"),
            vmem_limit_bytes=vmem_limit,
        ),
    )(x4)

    # Final W pairing: adjacent-lane max on the 4x-reduced intermediate.
    # TODO(synk): fold this lane de-interleave into the kernel once lane-strided
    # loads / minor-dim reshapes are reliably lowered by Mosaic; it only touches
    # 1/4 of the original bytes so its HBM cost is small.
    y = y.reshape(N, C, Do, Ho, Wo, 2)
    return jnp.max(y, axis=-1)


def _maxpool3d_ref(x):
    N, C, D, H, W = x.shape
    Do, Ho, Wo = D // 2, H // 2, W // 2
    x = x[:, :, : Do * 2, : Ho * 2, : Wo * 2]
    xr = x.reshape(N, C, Do, 2, Ho, 2, Wo, 2)
    return xr.max(axis=(3, 5, 7))


if __name__ == "__main__":
    key = jax.random.PRNGKey(0)

    # Small NCDHW input: batch=2, channels=4, spatial D=H=W=8
    x = jax.random.normal(key, (2, 4, 8, 8, 8), dtype=jnp.float32)
    y = jax.block_until_ready(maxpool3d_k2_s2(x))
    y_ref = _maxpool3d_ref(x)
    assert y.shape == (2, 4, 4, 4, 4), y.shape
    assert jnp.allclose(y, y_ref), "mismatch vs reference (even dims)"

    # Odd spatial dims exercise the floor-mode crop path.
    x2 = jax.random.normal(jax.random.PRNGKey(1), (1, 3, 5, 7, 9), dtype=jnp.float32)
    y2 = jax.block_until_ready(maxpool3d_k2_s2(x2))
    assert y2.shape == (1, 3, 2, 3, 4), y2.shape
    assert jnp.allclose(y2, _maxpool3d_ref(x2)), "mismatch vs reference (odd dims)"

    print("KERNEL_OK")
</pallas_src>

<mosaic_0001>
module attributes {stable_mosaic.version = 11 : i64} {
  func.func @_pool_dh_kernel(%arg0: i32, %arg1: i32, %arg2: memref<16x2x4x16xf32, #tpu.memory_space<vmem>>, %arg3: memref<16x4x8xf32, #tpu.memory_space<vmem>>) attributes {dimension_semantics = [#tpu.dimension_semantics<parallel>, #tpu.dimension_semantics<parallel>], iteration_bounds = array<i64: 2, 1>, scalar_prefetch = 0 : i64, scratch_operands = 0 : i64, tpu.core_type = #tpu.core_type<tc>, window_params = [{transform_indices = @transform_0, window_bounds = array<i64: 16, 2, 4, 16>}, {transform_indices = @transform_1, window_bounds = array<i64: 16, 4, 8>}]} {
    %c0 = arith.constant 0 : index
    %c0_0 = arith.constant 0 : index
    %c0_1 = arith.constant 0 : index
    %c0_2 = arith.constant 0 : index
    %0 = vector.load %arg2[%c0, %c0_0, %c0_1, %c0_2] : memref<16x2x4x16xf32, #tpu.memory_space<vmem>>, vector<16x1x4x8xf32>
    %1 = vector.shape_cast %0 : vector<16x1x4x8xf32> to vector<16x4x8xf32>
    %c0_3 = arith.constant 0 : index
    %c1 = arith.constant 1 : index
    %c0_4 = arith.constant 0 : index
    %c0_5 = arith.constant 0 : index
    %2 = vector.load %arg2[%c0_3, %c1, %c0_4, %c0_5] : memref<16x2x4x16xf32, #tpu.memory_space<vmem>>, vector<16x1x4x8xf32>
    %3 = vector.shape_cast %2 : vector<16x1x4x8xf32> to vector<16x4x8xf32>
    %c0_6 = arith.constant 0 : index
    %c0_7 = arith.constant 0 : index
    %c0_8 = arith.constant 0 : index
    %c8 = arith.constant 8 : index
    %4 = vector.load %arg2[%c0_6, %c0_7, %c0_8, %c8] : memref<16x2x4x16xf32, #tpu.memory_space<vmem>>, vector<16x1x4x8xf32>
    %5 = vector.shape_cast %4 : vector<16x1x4x8xf32> to vector<16x4x8xf32>
    %c0_9 = arith.constant 0 : index
    %c1_10 = arith.constant 1 : index
    %c0_11 = arith.constant 0 : index
    %c8_12 = arith.constant 8 : index
    %6 = vector.load %arg2[%c0_9, %c1_10, %c0_11, %c8_12] : memref<16x2x4x16xf32, #tpu.memory_space<vmem>>, vector<16x1x4x8xf32>
    %7 = vector.shape_cast %6 : vector<16x1x4x8xf32> to vector<16x4x8xf32>
    %8 = arith.maximumf %1, %3 : vector<16x4x8xf32>
    %9 = arith.maximumf %5, %7 : vector<16x4x8xf32>
    %10 = arith.maximumf %8, %9 : vector<16x4x8xf32>
    %c0_13 = arith.constant 0 : index
    %c0_14 = arith.constant 0 : index
    %c0_15 = arith.constant 0 : index
    %11 = vector.load %arg3[%c0_13, %c0_14, %c0_15] : memref<16x4x8xf32, #tpu.memory_space<vmem>>, vector<16x4x8xf32>
    tpu.vector_store %arg3[%c0_13, %c0_14, %c0_15], %10 {strides = array<i32>} : memref<16x4x8xf32, #tpu.memory_space<vmem>>, vector<16x4x8xf32>,
    return
  }
  func.func @transform_0(%arg0: i32, %arg1: i32) -> (i32, i32, i32, i32) {
    %c0_i32 = arith.constant 0 : i32
    %c0_i32_0 = arith.constant 0 : i32
    %c0_i32_1 = arith.constant 0 : i32
    return %arg0, %c0_i32, %arg1, %c0_i32_0 : i32, i32, i32, i32
  }
  func.func @transform_1(%arg0: i32, %arg1: i32) -> (i32, i32, i32) {
    %c0_i32 = arith.constant 0 : i32
    %c0_i32_0 = arith.constant 0 : i32
    return %arg0, %arg1, %c0_i32 : i32, i32, i32
  }
}

</mosaic_0001>

<bundles_post_ra>
// kernel: tpu_custom_call.1
= control target key start
LH: loop header
LB: loop body
LE: loop exit
PB: predicated region body
PF: predicated region fallthrough
CT: control target
= control target key end

     0   :  { %s470_s6 = smov 0   ;;  %s472_s7 = smov 0   ;;  %s619_s0 = inlined_call_operand.vmem [shape: f32[32,2,4,16], index: 0, kind: input, shape index: {}]   ;;  %s620_s1 = inlined_call_operand.vmem [shape: f32[32,4,8], index: 1, kind: output, shape index: {}]  }
   0x1   :  { %s474_s8 = smov 0  }
   0x2 LB: > { %s23_s9 = sadd.s32 1, %s453_s7  ;;  %p385_p0 = scmp.ge.s32.totalorder %s457_s8, 1  ;;  %s457_s8 = sphi %s474_s8, %s11_s8   ;;  %s453_s7 = sphi %s472_s7, %s622_s7   ;;  %s449_s6 = sphi %s470_s6, %s621_s6  }
   0x3   : > { %p25_p1 = scmp.ge.s32.totalorder %s23_s9, 2  ;;  %p108_p2 = scmp.lt.s32.totalorder %s457_s8, 3 }
   0x5   : > { %s624_s9 = smov (%p25_p1, %s23_s9), 0  ;;  %p109_p3 = pnand %p385_p0, %p108_p2 }
   0x6   : > { %s386_s10 = sshll.u32 (!%p109_p3), %s449_s6, 4  ;;  %s459_s15 = smov (!%p109_p3), 120  }
   0x7   : > { %112 = sbr.rel (%p109_p3) target bundleno = 165 (0xa5), region = 24  ;;  %p136_p4 = scmp.lt.s32.totalorder (!%p109_p3), %s386_s10, 31 }
   0xc   : > { %s626_s10 = smov (!%p136_p4, %s386_s10), 31  ;;  %vm283_vm0 = vcmask 60416  }
   0xd   : > { %s409_s11 = sshll.u32 %s626_s10, 3  ;;  %s390_s16 = sshll.u32 %s626_s10, 2 }
   0xe   : > { %s494_s14 = scalar_lea.vmem %s619_s0, %s409_s11  ;;  %s569_s19 = scalar_lea.vmem %s620_s1, %s390_s16 }
   0xf   : > { %v156_v0 = vld [vmem:[%s494_s14 + $0x10] sm:$0xf]  ;;  %v393_v1 = vld [vmem:[%s494_s14 + $0x14] sm:$0xf]  ;;  %v154_v2 = vld [vmem:[%s494_s14] sm:$0xf] }
  0x10   : > { %v499_v3 = vmax.f32 %v156_v0, %v393_v1  ;;  %v391_v4 = vld [vmem:[%s494_s14 + $0x4] sm:$0xf]  ;;  %v157_v5 = vld [vmem:[%s494_s14 + $0x18] sm:$0xf]  ;;  %v394_v6 = vld [vmem:[%s494_s14 + $0x1c] sm:$0xf] }
  0x11   : > { %v504_v7 = vmax.f32 %v154_v2, %v391_v4  ;;  %v155_v8 = vld [vmem:[%s494_s14 + $0x8] sm:$0xf]  ;;  %v392_v9 = vld [vmem:[%s494_s14 + $0xc] sm:$0xf]  ;;  %v510_v10 = vmax.f32 %v157_v5, %v394_v6  ;;  %v158_v14 = vld [vmem:[%s494_s14 + $0x20] sm:$0xf] }
  0x12   : > { %223 = vrot.lane.b32.xlu1 %v499_v3, %s459_s15  ;;  %v514_v11 = vmax.f32 %v155_v8, %v392_v9  ;;  %v159_v12 = vld [vmem:[%s494_s14 + $0x28] sm:$0xf]  ;;  %v396_v13 = vld [vmem:[%s494_s14 + $0x2c] sm:$0xf]  ;;  %v395_v15 = vld [vmem:[%s494_s14 + $0x24] sm:$0xf] }
  0x13   : > { %219 = vrot.lane.b32.xlu0 %v504_v7, %s459_s15  ;;  %v522_v16 = vmax.f32 %v159_v12, %v396_v13  ;;  %v526_v17 = vmax.f32 %v158_v14, %v395_v15  ;;  %v161_v18 = vld [vmem:[%s494_s14 + $0x38] sm:$0xf]  ;;  %v398_v19 = vld [vmem:[%s494_s14 + $0x3c] sm:$0xf]  ;;  %v160_v20 = vld [vmem:[%s494_s14 + $0x30] sm:$0xf] }
  0x14   : > { %v397_v21 = vld [vmem:[%s494_s14 + $0x34] sm:$0xf]  ;;  %v534_v22 = vmax.f32 %v161_v18, %v398_v19  ;;  %v163_v24 = vld [vmem:[%s494_s14 + $0x48] sm:$0xf]  ;;  %v400_v25 = vld [vmem:[%s494_s14 + $0x4c] sm:$0xf] }
  0x15   : > { %v193_v23 = vmax.f32 %v160_v20, %v397_v21  ;;  %v162_v26 = vld [vmem:[%s494_s14 + $0x40] sm:$0xf]  ;;  %v399_v27 = vld [vmem:[%s494_s14 + $0x44] sm:$0xf]  ;;  %v196_v28 = vmax.f32 %v163_v24, %v400_v25  ;;  %v165_v30 = vld [vmem:[%s494_s14 + $0x58] sm:$0xf] }
  0x16   : > { %225 = vrot.lane.b32.xlu1 %v510_v10, %s459_s15  ;;  %v195_v29 = vmax.f32 %v162_v26, %v399_v27  ;;  %v402_v31 = vld [vmem:[%s494_s14 + $0x5c] sm:$0xf]  ;;  %v164_v32 = vld [vmem:[%s494_s14 + $0x50] sm:$0xf]  ;;  %v401_v33 = vld [vmem:[%s494_s14 + $0x54] sm:$0xf] }
  0x17   : > { %221 = vrot.lane.b32.xlu0 %v514_v11, %s459_s15  ;;  %v198_v34 = vmax.f32 %v165_v30, %v402_v31  ;;  %v197_v35 = vmax.f32 %v164_v32, %v401_v33  ;;  %v167_v36 = vld [vmem:[%s494_s14 + $0x68] sm:$0xf]  ;;  %v404_v37 = vld [vmem:[%s494_s14 + $0x6c] sm:$0xf]  ;;  %v166_v38 = vld [vmem:[%s494_s14 + $0x60] sm:$0xf] }
  0x18   : > { %v403_v39 = vld [vmem:[%s494_s14 + $0x64] sm:$0xf]  ;;  %v200_v40 = vmax.f32 %v167_v36, %v404_v37  ;;  %v169_v42 = vld [vmem:[%s494_s14 + $0x78] sm:$0xf]  ;;  %v406_v43 = vld [vmem:[%s494_s14 + $0x7c] sm:$0xf] }
  0x19   : > { %v199_v41 = vmax.f32 %v166_v38, %v403_v39  ;;  %v168_v44 = vld [vmem:[%s494_s14 + $0x70] sm:$0xf]  ;;  %v405_v45 = vld [vmem:[%s494_s14 + $0x74] sm:$0xf]  ;;  %v202_v46 = vmax.f32 %v169_v42, %v406_v43 }
  0x1a   : > { %229 = vrot.lane.b32.xlu1 %v522_v16, %s459_s15  ;;  %v201_v47 = vmax.f32 %v168_v44, %v405_v45 }
  0x1b   : > { %227 = vrot.lane.b32.xlu0 %v526_v17, %s459_s15 }
  0x1e   : > { %233 = vrot.lane.b32.xlu1 %v534_v22, %s459_s15 }
  0x1f   : > { %231 = vrot.lane.b32.xlu0 %v193_v23, %s459_s15 }
  0x22   : > { %237 = vrot.lane.b32.xlu1 %v196_v28, %s459_s15 }
  0x23   : > { %235 = vrot.lane.b32.xlu0 %v195_v29, %s459_s15 }
  0x26   : > { %241 = vrot.lane.b32.xlu1 %v198_v34, %s459_s15 }
  0x27   : > { %239 = vrot.lane.b32.xlu0 %v197_v35, %s459_s15 }
  0x2a   : > { %245 = vrot.lane.b32.xlu1 %v200_v40, %s459_s15 }
  0x2b   : > { %243 = vrot.lane.b32.xlu0 %v199_v41, %s459_s15 }
  0x2e   : > { %249 = vrot.lane.b32.xlu1 %v202_v46, %s459_s15 }
  0x2f   : > { %247 = vrot.lane.b32.xlu0 %v201_v47, %s459_s15 }
  0x84   : > { %v224_v48 = vpop.permute.xlu1 %223 }
  0x85   : > { %v269_v49 = vmax.f32 %v499_v3, %v224_v48  ;;  %v220_v50 = vpop.permute.xlu0 %219 }
  0x86   : > { %v267_v51 = vmax.f32 %v504_v7, %v220_v50 }
  0x87   : > { %286 = vst.msk [vmem:[%s569_s19 + $0x8] sm:$0xf] %vm283_vm0, %v269_v49 }
  0x88   : > { %284 = vst.msk [vmem:[%s569_s19] sm:$0xf] %vm283_vm0, %v267_v51  ;;  %v226_v52 = vpop.permute.xlu1 %225 }
  0x89   : > { %v270_v53 = vmax.f32 %v510_v10, %v226_v52  ;;  %v222_v54 = vpop.permute.xlu0 %221 }
  0x8a   : > { %v268_v55 = vmax.f32 %v514_v11, %v222_v54 }
  0x8b   : > { %287 = vst.msk [vmem:[%s569_s19 + $0xc] sm:$0xf] %vm283_vm0, %v270_v53 }
  0x8c   : > { %285 = vst.msk [vmem:[%s569_s19 + $0x4] sm:$0xf] %vm283_vm0, %v268_v55  ;;  %v230_v56 = vpop.permute.xlu1 %229 }
  0x8d   : > { %v272_v57 = vmax.f32 %v522_v16, %v230_v56  ;;  %v228_v58 = vpop.permute.xlu0 %227 }
  0x8e   : > { %v271_v59 = vmax.f32 %v526_v17, %v228_v58 }
  0x8f   : > { %289 = vst.msk [vmem:[%s569_s19 + $0x14] sm:$0xf] %vm283_vm0, %v272_v57 }
  0x90   : > { %288 = vst.msk [vmem:[%s569_s19 + $0x10] sm:$0xf] %vm283_vm0, %v271_v59  ;;  %v234_v60 = vpop.permute.xlu1 %233 }
  0x91   : > { %v274_v61 = vmax.f32 %v534_v22, %v234_v60  ;;  %v232_v62 = vpop.permute.xlu0 %231 }
  0x92   : > { %v273_v63 = vmax.f32 %v193_v23, %v232_v62 }
  0x93   : > { %291 = vst.msk [vmem:[%s569_s19 + $0x1c] sm:$0xf] %vm283_vm0, %v274_v61 }
  0x94   : > { %290 = vst.msk [vmem:[%s569_s19 + $0x18] sm:$0xf] %vm283_vm0, %v273_v63  ;;  %v238_v0 = vpop.permute.xlu1 %237 }
  0x95   : > { %v276_v1 = vmax.f32 %v196_v28, %v238_v0  ;;  %v236_v2 = vpop.permute.xlu0 %235 }
  0x96   : > { %v275_v3 = vmax.f32 %v195_v29, %v236_v2 }
  0x97   : > { %293 = vst.msk [vmem:[%s569_s19 + $0x24] sm:$0xf] %vm283_vm0, %v276_v1 }
  0x98   : > { %292 = vst.msk [vmem:[%s569_s19 + $0x20] sm:$0xf] %vm283_vm0, %v275_v3  ;;  %v242_v4 = vpop.permute.xlu1 %241 }
  0x99   : > { %v278_v5 = vmax.f32 %v198_v34, %v242_v4  ;;  %v240_v6 = vpop.permute.xlu0 %239 }
  0x9a   : > { %v277_v7 = vmax.f32 %v197_v35, %v240_v6 }
  0x9b   : > { %295 = vst.msk [vmem:[%s569_s19 + $0x2c] sm:$0xf] %vm283_vm0, %v278_v5 }
  0x9c   : > { %294 = vst.msk [vmem:[%s569_s19 + $0x28] sm:$0xf] %vm283_vm0, %v277_v7  ;;  %v246_v8 = vpop.permute.xlu1 %245 }
  0x9d   : > { %v280_v9 = vmax.f32 %v200_v40, %v246_v8  ;;  %v244_v10 = vpop.permute.xlu0 %243 }
  0x9e   : > { %v279_v11 = vmax.f32 %v199_v41, %v244_v10 }
  0x9f   : > { %297 = vst.msk [vmem:[%s569_s19 + $0x34] sm:$0xf] %vm283_vm0, %v280_v9 }
  0xa0   : > { %296 = vst.msk [vmem:[%s569_s19 + $0x30] sm:$0xf] %vm283_vm0, %v279_v11  ;;  %v250_v12 = vpop.permute.xlu1 %249 }
  0xa1   : > { %v282_v13 = vmax.f32 %v202_v46, %v250_v12  ;;  %v248_v14 = vpop.permute.xlu0 %247 }
  0xa2   : > { %v281_v15 = vmax.f32 %v201_v47, %v248_v14 }
  0xa3   : > { %299 = vst.msk [vmem:[%s569_s19 + $0x3c] sm:$0xf] %vm283_vm0, %v282_v13 }
  0xa4   : > { %298 = vst.msk [vmem:[%s569_s19 + $0x38] sm:$0xf] %vm283_vm0, %v281_v15 }
  0xa5 PF: > { %s11_s8 = sadd.s32 1, %s457_s8   ;;  %s621_s6 = smov %s453_s7 }
  0xa6   : > { %p8_p5 = scmp.ge.s32.totalorder %s11_s8, 4   ;;  %s622_s7 = smov %s624_s9 }
  0xa8   :  { %10 = sbr.rel (!%p8_p5) target bundleno = 2 (0x2), region = 55 }

</bundles_post_ra>
